<compile_context>
chip_gen: v5e
topology: v5e:2x2
jax: 0.10.0
libtpu: 0.0.40
codegen_flags: <defaults>
</compile_context>

<pallas_src>
import jax
import jax.numpy as jnp
from jax.experimental import pallas as pl
from jax.experimental.pallas import tpu as pltpu

_SUBLANE = 8  # batch tile must be a multiple of the sublane count


def _cdiv(a, b):
    return -(-a // b)


def _round_up(x, m):
    return _cdiv(x, m) * m


def _mosoftq_kernel(x_ref, w1_ref, b1_ref, w2_ref, b2_ref, w3_ref, b3_ref,
                    out_ref):
    """One batch tile of the 3-layer MLP (bf16 MXU matmuls, f32 accumulation)."""
    # Layer 1: Linear + ReLU (bias add in f32, ReLU in bf16 - identical result).
    h1 = jnp.dot(x_ref[...], w1_ref[...], preferred_element_type=jnp.float32)
    h1 = jnp.maximum((h1 + b1_ref[...]).astype(jnp.bfloat16), 0)

    # Layer 2: Linear + ReLU
    h2 = jnp.dot(h1, w2_ref[...], preferred_element_type=jnp.float32)
    h2 = jnp.maximum((h2 + b2_ref[...]).astype(jnp.bfloat16), 0)

    # Output layer (no activation), narrow reward_dim-wide store.
    q = jnp.dot(h2, w3_ref[...], preferred_element_type=jnp.float32)
    out_ref[...] = q + b3_ref[...]


def prepare_params(params):
    """One-time weight prep (hoisted out of the per-call hot path)."""
    return {
        "w1": params["w1"].astype(jnp.bfloat16),
        "b1": params["b1"].astype(jnp.float32).reshape(1, -1),
        "w2": params["w2"].astype(jnp.bfloat16),
        "b2": params["b2"].astype(jnp.float32).reshape(1, -1),
        "w3": params["w3"].astype(jnp.bfloat16),
        "b3": params["b3"].astype(jnp.float32).reshape(1, -1),
    }


def mosoftq_forward(obs, act, prepared, *, max_batch_tile=2048):
    """Pallas implementation of MOSoftQNetwork.forward(x, a)."""
    batch, obs_dim = obs.shape
    act_dim = act.shape[1]
    in_dim = obs_dim + act_dim
    h1_dim = prepared["w1"].shape[1]
    h2_dim = prepared["w2"].shape[1]
    reward_dim = prepared["w3"].shape[1]

    # Balanced batch tiling: tb multiple of 8 sublanes, minimal zero-row pad,
    # and >=2 grid steps whenever batch allows (so the 2 TCs on v7x both work).
    num_tiles = max(1, _cdiv(batch, max_batch_tile))
    if batch >= 2 * _SUBLANE:
        num_tiles = max(num_tiles, 2)
    tb = _round_up(_cdiv(batch, num_tiles), _SUBLANE)
    bp = _round_up(batch, tb)
    grid = (bp // tb,)

    # Single concatenated bf16 input (one layer-1 matmul, one DMA stream).
    x = jnp.concatenate([obs, act], axis=-1).astype(jnp.bfloat16)
    if bp != batch:
        x = jnp.pad(x, ((0, bp - batch), (0, 0)))

    # Advisory cost estimate for XLA scheduling around the custom call.
    flops = 2 * bp * (in_dim * h1_dim + h1_dim * h2_dim + h2_dim * reward_dim)
    bytes_accessed = (
        bp * in_dim * 2                                                  # input
        + (in_dim * h1_dim + h1_dim * h2_dim + h2_dim * reward_dim) * 2  # weights
        + (h1_dim + h2_dim + reward_dim) * 4                             # biases
        + bp * reward_dim * 4)                                           # output
    cost = pl.CostEstimate(flops=flops, transcendentals=0,
                           bytes_accessed=bytes_accessed)

    # Explicit VMEM budget: double-buffered activation tiles + resident weights
    # + f32/bf16 intermediates, with 2x headroom (well under 64 MiB on v7x,
    # above the 16 MiB scoped default on v5e when tb is large).
    vmem_bytes = (
        2 * tb * in_dim * 2                                              # in tiles
        + 2 * tb * reward_dim * 4                                        # out tiles
        + (in_dim * h1_dim + h1_dim * h2_dim + h2_dim * reward_dim) * 2  # weights
        + (h1_dim + h2_dim + reward_dim) * 4                             # biases
        + tb * (h1_dim + h2_dim) * 6)                                    # h1/h2
    vmem_limit = int(min(max(2 * vmem_bytes, 4 * 1024 * 1024),
                         48 * 1024 * 1024))

    out = pl.pallas_call(
        _mosoftq_kernel,
        out_shape=jax.ShapeDtypeStruct((bp, reward_dim), jnp.float32),
        grid=grid,
        in_specs=[
            pl.BlockSpec((tb, in_dim), lambda i: (i, 0)),         # x tile
            pl.BlockSpec((in_dim, h1_dim), lambda i: (0, 0)),     # W1
            pl.BlockSpec((1, h1_dim), lambda i: (0, 0)),          # b1
            pl.BlockSpec((h1_dim, h2_dim), lambda i: (0, 0)),     # W2
            pl.BlockSpec((1, h2_dim), lambda i: (0, 0)),          # b2
            pl.BlockSpec((h2_dim, reward_dim), lambda i: (0, 0)), # W3
            pl.BlockSpec((1, reward_dim), lambda i: (0, 0)),      # b3
        ],
        out_specs=pl.BlockSpec((tb, reward_dim), lambda i: (i, 0)),
        compiler_params=pltpu.CompilerParams(
            dimension_semantics=("parallel",),
            vmem_limit_bytes=vmem_limit),
        cost_estimate=cost,
    )(x, prepared["w1"], prepared["b1"], prepared["w2"], prepared["b2"],
      prepared["w3"], prepared["b3"])

    return out[:batch]


def init_params(key, in_dim, net_arch, reward_dim):
    """Deterministic synthetic parameter init (scaled normal weights/biases)."""
    dims = [in_dim] + list(net_arch) + [reward_dim]
    params = {}
    for i in range(len(dims) - 1):
        key, wkey, bkey = jax.random.split(key, 3)
        fan_in, fan_out = dims[i], dims[i + 1]
        scale = 1.0 / jnp.sqrt(jnp.float32(fan_in))
        params[f"w{i + 1}"] = (
            scale * jax.random.normal(wkey, (fan_in, fan_out), jnp.float32))
        params[f"b{i + 1}"] = (
            0.01 * jax.random.normal(bkey, (1, fan_out), jnp.float32))
    return params


def reference_forward(obs, act, params, compute_dtype=jnp.float32):
    """Pure-JAX reference of the same MLP (optionally bf16-matched)."""
    x = jnp.concatenate([obs, act], axis=-1).astype(compute_dtype)
    w1 = params["w1"].astype(compute_dtype)
    w2 = params["w2"].astype(compute_dtype)
    w3 = params["w3"].astype(compute_dtype)
    h1 = jnp.maximum(
        jnp.dot(x, w1, preferred_element_type=jnp.float32) + params["b1"],
        0.0).astype(compute_dtype)
    h2 = jnp.maximum(
        jnp.dot(h1, w2, preferred_element_type=jnp.float32) + params["b2"],
        0.0).astype(compute_dtype)
    return jnp.dot(h2, w3, preferred_element_type=jnp.float32) + params["b3"]


if __name__ == "__main__":
    # Small shapes consistent with the module: continuous obs/action vectors,
    # default net_arch=[256, 256] (multiples of 128 so MXU tiles are filled).
    batch = 8
    obs_dim = 16          # obs_shape = (16,)
    act_dim = 8           # action_shape = (8,)
    reward_dim = 4        # multi-objective reward dimension
    net_arch = [256, 256]

    key = jax.random.PRNGKey(0)
    k_obs, k_act, k_params = jax.random.split(key, 3)

    obs = jax.random.normal(k_obs, (batch, obs_dim), jnp.float32)
    act = jax.random.normal(k_act, (batch, act_dim), jnp.float32)
    params = init_params(k_params, obs_dim + act_dim, net_arch, reward_dim)

    # One-time weight prep outside the hot path, jit the forward itself.
    prepared = prepare_params(params)
    fwd = jax.jit(mosoftq_forward)

    q = fwd(obs, act, prepared)
    q = jax.block_until_ready(q)
    assert q.shape == (batch, reward_dim)

    # Tight check against a bf16-matched reference (same MXU numerics).
    q_bf16_ref = reference_forward(obs, act, params, compute_dtype=jnp.bfloat16)
    assert jnp.allclose(q, q_bf16_ref, atol=2e-3, rtol=2e-3)

    # Loose sanity check against the full-f32 reference (bf16 rounding only).
    # NOTE: bf16 weights/activations are an intentional precision deviation
    # from the f32 PyTorch module.
    q_f32_ref = reference_forward(obs, act, params, compute_dtype=jnp.float32)
    assert jnp.allclose(q, q_f32_ref, atol=1e-1, rtol=1e-1)

    print("KERNEL_OK")
</pallas_src>

<mosaic_0001>
module attributes {stable_mosaic.version = 11 : i64} {
  func.func @_mosoftq_kernel(%arg0: i32, %arg1: memref<8x24xbf16, #tpu.memory_space<vmem>>, %arg2: memref<24x256xbf16, #tpu.memory_space<vmem>>, %arg3: memref<1x256xf32, #tpu.memory_space<vmem>>, %arg4: memref<256x256xbf16, #tpu.memory_space<vmem>>, %arg5: memref<1x256xf32, #tpu.memory_space<vmem>>, %arg6: memref<256x4xbf16, #tpu.memory_space<vmem>>, %arg7: memref<1x4xf32, #tpu.memory_space<vmem>>, %arg8: memref<8x4xf32, #tpu.memory_space<vmem>>) attributes {dimension_semantics = [#tpu.dimension_semantics<parallel>], iteration_bounds = array<i64: 1>, scalar_prefetch = 0 : i64, scratch_operands = 0 : i64, tpu.core_type = #tpu.core_type<tc>, window_params = [{transform_indices = @transform_0, window_bounds = array<i64: 8, 24>}, {pipeline_mode = #tpu.pipeline_mode<synchronous>, transform_indices = @transform_1, window_bounds = array<i64: 24, 256>}, {pipeline_mode = #tpu.pipeline_mode<synchronous>, transform_indices = @transform_2, window_bounds = array<i64: 1, 256>}, {pipeline_mode = #tpu.pipeline_mode<synchronous>, transform_indices = @transform_3, window_bounds = array<i64: 256, 256>}, {pipeline_mode = #tpu.pipeline_mode<synchronous>, transform_indices = @transform_4, window_bounds = array<i64: 1, 256>}, {pipeline_mode = #tpu.pipeline_mode<synchronous>, transform_indices = @transform_5, window_bounds = array<i64: 256, 4>}, {pipeline_mode = #tpu.pipeline_mode<synchronous>, transform_indices = @transform_6, window_bounds = array<i64: 1, 4>}, {transform_indices = @transform_7, window_bounds = array<i64: 8, 4>}]} {
    %c0 = arith.constant 0 : index
    %c0_0 = arith.constant 0 : index
    %0 = vector.load %arg1[%c0, %c0_0] : memref<8x24xbf16, #tpu.memory_space<vmem>>, vector<8x24xbf16>
    %c0_1 = arith.constant 0 : index
    %c0_2 = arith.constant 0 : index
    %1 = vector.load %arg2[%c0_1, %c0_2] : memref<24x256xbf16, #tpu.memory_space<vmem>>, vector<24x256xbf16>
    %cst = arith.constant dense<0.000000e+00> : vector<8x256xf32>
    %2 = tpu.matmul %0, %1, %cst {dimension_numbers = #tpu.dot_dimension_numbers<[1], [0], [0], [1], [0, 0, 1, 1], [], []>} : vector<8x24xbf16>, vector<24x256xbf16>, vector<8x256xf32> -> vector<8x256xf32>
    %c0_3 = arith.constant 0 : index
    %c0_4 = arith.constant 0 : index
    %3 = vector.load %arg3[%c0_3, %c0_4] : memref<1x256xf32, #tpu.memory_space<vmem>>, vector<1x256xf32>
    %4 = vector.broadcast %3 : vector<1x256xf32> to vector<8x256xf32>
    %5 = arith.addf %2, %4 : vector<8x256xf32>
    %6 = arith.truncf %5 : vector<8x256xf32> to vector<8x256xbf16>
    %cst_5 = arith.constant 0.000000e+00 : bf16
    %7 = vector.broadcast %cst_5 : bf16 to vector<8x256xbf16>
    %8 = arith.maximumf %6, %7 : vector<8x256xbf16>
    %c0_6 = arith.constant 0 : index
    %c0_7 = arith.constant 0 : index
    %9 = vector.load %arg4[%c0_6, %c0_7] : memref<256x256xbf16, #tpu.memory_space<vmem>>, vector<256x256xbf16>
    %cst_8 = arith.constant dense<0.000000e+00> : vector<8x256xf32>
    %10 = tpu.matmul %8, %9, %cst_8 {dimension_numbers = #tpu.dot_dimension_numbers<[1], [0], [0], [1], [0, 0, 1, 1], [], []>} : vector<8x256xbf16>, vector<256x256xbf16>, vector<8x256xf32> -> vector<8x256xf32>
    %c0_9 = arith.constant 0 : index
    %c0_10 = arith.constant 0 : index
    %11 = vector.load %arg5[%c0_9, %c0_10] : memref<1x256xf32, #tpu.memory_space<vmem>>, vector<1x256xf32>
    %12 = vector.broadcast %11 : vector<1x256xf32> to vector<8x256xf32>
    %13 = arith.addf %10, %12 : vector<8x256xf32>
    %14 = arith.truncf %13 : vector<8x256xf32> to vector<8x256xbf16>
    %cst_11 = arith.constant 0.000000e+00 : bf16
    %15 = vector.broadcast %cst_11 : bf16 to vector<8x256xbf16>
    %16 = arith.maximumf %14, %15 : vector<8x256xbf16>
    %c0_12 = arith.constant 0 : index
    %c0_13 = arith.constant 0 : index
    %17 = vector.load %arg6[%c0_12, %c0_13] : memref<256x4xbf16, #tpu.memory_space<vmem>>, vector<256x4xbf16>
    %cst_14 = arith.constant dense<0.000000e+00> : vector<8x4xf32>
    %18 = tpu.matmul %16, %17, %cst_14 {dimension_numbers = #tpu.dot_dimension_numbers<[1], [0], [0], [1], [0, 0, 1, 1], [], []>} : vector<8x256xbf16>, vector<256x4xbf16>, vector<8x4xf32> -> vector<8x4xf32>
    %c0_15 = arith.constant 0 : index
    %c0_16 = arith.constant 0 : index
    %19 = vector.load %arg7[%c0_15, %c0_16] : memref<1x4xf32, #tpu.memory_space<vmem>>, vector<1x4xf32>
    %20 = vector.broadcast %19 : vector<1x4xf32> to vector<8x4xf32>
    %21 = arith.addf %18, %20 : vector<8x4xf32>
    %c0_17 = arith.constant 0 : index
    %c0_18 = arith.constant 0 : index
    %22 = vector.load %arg8[%c0_17, %c0_18] : memref<8x4xf32, #tpu.memory_space<vmem>>, vector<8x4xf32>
    tpu.vector_store %arg8[%c0_17, %c0_18], %21 {strides = array<i32>} : memref<8x4xf32, #tpu.memory_space<vmem>>, vector<8x4xf32>,
    return
  }
  func.func @transform_0(%arg0: i32) -> (i32, i32) {
    %c0_i32 = arith.constant 0 : i32
    %c0_i32_0 = arith.constant 0 : i32
    return %arg0, %c0_i32 : i32, i32
  }
  func.func @transform_1(%arg0: i32) -> (i32, i32) {
    %c0_i32 = arith.constant 0 : i32
    %c0_i32_0 = arith.constant 0 : i32
    %c0_i32_1 = arith.constant 0 : i32
    return %c0_i32, %c0_i32_0 : i32, i32
  }
  func.func @transform_2(%arg0: i32) -> (i32, i32) {
    %c0_i32 = arith.constant 0 : i32
    %c0_i32_0 = arith.constant 0 : i32
    %c0_i32_1 = arith.constant 0 : i32
    return %c0_i32, %c0_i32_0 : i32, i32
  }
  func.func @transform_3(%arg0: i32) -> (i32, i32) {
    %c0_i32 = arith.constant 0 : i32
    %c0_i32_0 = arith.constant 0 : i32
    %c0_i32_1 = arith.constant 0 : i32
    return %c0_i32, %c0_i32_0 : i32, i32
  }
  func.func @transform_4(%arg0: i32) -> (i32, i32) {
    %c0_i32 = arith.constant 0 : i32
    %c0_i32_0 = arith.constant 0 : i32
    %c0_i32_1 = arith.constant 0 : i32
    return %c0_i32, %c0_i32_0 : i32, i32
  }
  func.func @transform_5(%arg0: i32) -> (i32, i32) {
    %c0_i32 = arith.constant 0 : i32
    %c0_i32_0 = arith.constant 0 : i32
    %c0_i32_1 = arith.constant 0 : i32
    return %c0_i32, %c0_i32_0 : i32, i32
  }
  func.func @transform_6(%arg0: i32) -> (i32, i32) {
    %c0_i32 = arith.constant 0 : i32
    %c0_i32_0 = arith.constant 0 : i32
    %c0_i32_1 = arith.constant 0 : i32
    return %c0_i32, %c0_i32_0 : i32, i32
  }
  func.func @transform_7(%arg0: i32) -> (i32, i32) {
    %c0_i32 = arith.constant 0 : i32
    %c0_i32_0 = arith.constant 0 : i32
    return %arg0, %c0_i32 : i32, i32
  }
}

</mosaic_0001>

<bundles_post_ra>
// kernel: mosoftq_forward.1
= control target key start
LH: loop header
LB: loop body
LE: loop exit
PB: predicated region body
PF: predicated region fallthrough
CT: control target
= control target key end

     0   :  { %12 = vsyncpa [#allocation3], 0  ;;  %s816_s27 = smov [#allocation2]   ;;  %s817_s29 = smov 128   ;;  %s942_s0 = inlined_call_operand.vmem [shape: bf16[8,24], index: 0, kind: input, shape index: {}]   ;;  %s943_s1 = inlined_call_operand.vmem [shape: bf16[24,256], index: 1, kind: input, shape index: {}]   ;;  %s944_s2 = inlined_call_operand.vmem [shape: f32[1,256], index: 2, kind: input, shape index: {}]   ;;  %s945_s3 = inlined_call_operand.hbm [shape: bf16[256,256], index: 3, kind: input, shape index: {}]   ;;  %s946_s4 = inlined_call_operand.vmem [shape: f32[1,256], index: 4, kind: input, shape index: {}]   ;;  %s947_s5 = inlined_call_operand.vmem [shape: bf16[256,4], index: 5, kind: input, shape index: {}]   ;;  %s948_s6 = inlined_call_operand.vmem [shape: f32[1,4], index: 6, kind: input, shape index: {}]   ;;  %s949_s7 = inlined_call_operand.vmem [shape: f32[8,4], index: 7, kind: output, shape index: {}]  }
   0x1   :  { %s23_s26 = sshll.u32 %s945_s3, 4  ;;  %s25_s28 = sshll.u32 %s816_s27, 4  ;;  %s24_s26 = int_to_ptr.hbm [resolvable:$true] %s23_s26  ;;  %s26_s28 = int_to_ptr.vmem [resolvable:$true] %s25_s28 }
   0x2   :  { %s818_s30 = smov 8  }
   0x3   :  { %31 = dma.hbm_to_vmem [thread:$0]  %s24_s26, 4096, %s26_s28, [#allocation3], %s817_s29, %s817_s29, %s818_s30  }
   0x4   :  { %814 = dma.done.wait [#allocation3], 4096  }
   0x5   :  { %815 = vsyncadd [#allocation3], 4294963200  ;;  %v46_v0 = vld [vmem:[%s943_s1 + $0x10] sm:$0xff]  ;;  %vm72_vm0 = vcmask 1043456   ;;  %v536_v3 = vld [vmem:[%s943_s1] sm:$0xf] }
   0x6   :  { %v60_v1 = vunpack.c.l.b16 %v46_v0  ;;  %v61_v2 = vunpack.c.h.b16 %v46_v0  ;;  %v737_v4 = vld [vmem:[%s943_s1 + $0x4] sm:$0xf0]  ;;  %v736_v5 = vld [vmem:[%s943_s1 + $0x4] sm:$0xf]  ;;  %v538_v6 = vld [vmem:[%s943_s1 + $0x8] sm:$0xf0] }
   0x7   :  { %v602_v7 = vld [vmem:[#allocation2 + $0x70] sm:$0xf]  ;;  %v753_v8 = vld [vmem:[#allocation2 + $0x74] sm:$0xf0]  ;;  %v752_v14 = vld [vmem:[#allocation2 + $0x74] sm:$0xf]  ;;  %v537_v24 = vor.u32 %v737_v4, %v536_v3  ;;  %v541_v25 = vor.u32 %v736_v5, %v538_v6 }
   0x8   :  { %v666_v9 = vld [vmem:[#allocation2 + $0xf0] sm:$0xf]  ;;  %v64_v10 = vpack.c.b16 %v60_v1, %v60_v1  ;;  %v65_v11 = vpack.c.b16 %v61_v2, %v61_v2  ;;  %v603_v12 = vor.u32 %v753_v8, %v602_v7  ;;  %v769_v13 = vld [vmem:[#allocation2 + $0xf4] sm:$0xf0]  ;;  %v604_v15 = vld [vmem:[#allocation2 + $0x78] sm:$0xf0] }
   0x9   :  { %v667_v16 = vor.u32 %v769_v13, %v666_v9  ;;  %v768_v17 = vld [vmem:[#allocation2 + $0xf4] sm:$0xf]  ;;  %v668_v18 = vld [vmem:[#allocation2 + $0xf8] sm:$0xf0]  ;;  %v594_v19 = vld [vmem:[#allocation2 + $0x60] sm:$0xf]  ;;  %v607_v28 = vor.u32 %v752_v14, %v604_v15 }
   0xa   :  { %v74_v20 = vsel %vm72_vm0, %v64_v10, 0  ;;  %v77_v21 = vsel %vm72_vm0, %v65_v11, 0  ;;  %310 = vmatpush.bf16.msra.mxu2 %v603_v12  ;;  %v751_v22 = vld [vmem:[#allocation2 + $0x64] sm:$0xf0]  ;;  %v658_v23 = vld [vmem:[#allocation2 + $0xe0] sm:$0xf]  ;;  %v671_v29 = vor.u32 %v768_v17, %v668_v18 }
   0xb   :  { %85 = vmatpush.bf16.msra.mxu0 %v74_v20  ;;  %98 = vmatpush.bf16.msra.mxu1 %v77_v21  ;;  %v595_v26 = vor.u32 %v751_v22, %v594_v19  ;;  %v767_v27 = vld [vmem:[#allocation2 + $0xe4] sm:$0xf0]  ;;  %v750_v30 = vld [vmem:[#allocation2 + $0x64] sm:$0xf]  ;;  %v596_v31 = vld [vmem:[#allocation2 + $0x68] sm:$0xf0] }
   0xc   :  { %323 = vmatpush.bf16.msra.mxu3 %v667_v16  ;;  %v586_v32 = vld [vmem:[#allocation2 + $0x50] sm:$0xf]  ;;  %v659_v33 = vor.u32 %v767_v27, %v658_v23  ;;  %v766_v34 = vld [vmem:[#allocation2 + $0xe4] sm:$0xf]  ;;  %v660_v35 = vld [vmem:[#allocation2 + $0xe8] sm:$0xf0]  ;;  %v599_v41 = vor.u32 %v750_v30, %v596_v31 }
   0xd   :  { %v749_v36 = vld [vmem:[#allocation2 + $0x54] sm:$0xf0]  ;;  %v650_v37 = vld [vmem:[#allocation2 + $0xd0] sm:$0xf]  ;;  %v43_v39 = vld [vmem:[%s942_s0] sm:$0xf]  ;;  %v663_v42 = vor.u32 %v766_v34, %v660_v35 }
   0xe   :  { %311 = vmatpush.bf16.msra.mxu2 %v595_v26  ;;  %v765_v38 = vld [vmem:[#allocation2 + $0xd4] sm:$0xf0]  ;;  %vm68_vm1 = vcmask 195584   ;;  %v587_v40 = vor.u32 %v749_v36, %v586_v32  ;;  %v748_v43 = vld [vmem:[#allocation2 + $0x54] sm:$0xf]  ;;  %vm527_vm2 = vcmask 31744  }
   0xf   :  { %86 = vmatpush.bf16.msra.mxu0 %v537_v24  ;;  %99 = vmatpush.bf16.msra.mxu1 %v541_v25  ;;  %v578_v44 = vld [vmem:[#allocation2 + $0x40] sm:$0xf]  ;;  %v747_v45 = vld [vmem:[#allocation2 + $0x44] sm:$0xf0]  ;;  %v651_v46 = vor.u32 %v765_v38, %v650_v37  ;;  %v588_v47 = vld [vmem:[#allocation2 + $0x58] sm:$0xf0] }
  0x10   :  { %324 = vmatpush.bf16.msra.mxu3 %v659_v33  ;;  %v764_v48 = vld [vmem:[#allocation2 + $0xd4] sm:$0xf]  ;;  %v652_v49 = vld [vmem:[#allocation2 + $0xd8] sm:$0xf0]  ;;  %v642_v50 = vld [vmem:[#allocation2 + $0xc0] sm:$0xf]  ;;  %v579_v52 = vor.u32 %v747_v45, %v578_v44  ;;  %v591_v53 = vor.u32 %v748_v43, %v588_v47 }
  0x11   :  { %v763_v51 = vld [vmem:[#allocation2 + $0xc4] sm:$0xf0]  ;;  %v655_v54 = vor.u32 %v764_v48, %v652_v49  ;;  %v746_v55 = vld [vmem:[#allocation2 + $0x44] sm:$0xf]  ;;  %v570_v56 = vld [vmem:[#allocation2 + $0x30] sm:$0xf] }
  0x12   :  { %542 = vmatmul.msk.bf16.vlgmr.msra.gmra.mxu0 %vm68_vm1, %v43_v39  ;;  %543 = vmatmul.msk.bf16.vlgmr.msra.gmra.mxu1 %vm68_vm1, %v43_v39  ;;  %v745_v57 = vld [vmem:[#allocation2 + $0x34] sm:$0xf0]  ;;  %v643_v58 = vor.u32 %v763_v51, %v642_v50  ;;  %v580_v59 = vld [vmem:[#allocation2 + $0x48] sm:$0xf0]  ;;  %v762_v60 = vld [vmem:[#allocation2 + $0xc4] sm:$0xf] }
  0x13   :  { %336 = vmatpush.bf16.msrb.mxu0 %v607_v28  ;;  %349 = vmatpush.bf16.msrb.mxu1 %v671_v29  ;;  %v644_v61 = vld [vmem:[#allocation2 + $0xc8] sm:$0xf0]  ;;  %v634_v62 = vld [vmem:[#allocation2 + $0xb0] sm:$0xf]  ;;  %v761_v63 = vld [vmem:[#allocation2 + $0xb4] sm:$0xf0]  ;;  %v571_v0 = vor.u32 %v745_v57, %v570_v56  ;;  %v583_v1 = vor.u32 %v746_v55, %v580_v59 }
  0x14   :  { %312 = vmatpush.bf16.msra.mxu2 %v587_v40  ;;  %325 = vmatpush.bf16.msra.mxu3 %v651_v46  ;;  %v647_v2 = vor.u32 %v762_v60, %v644_v61  ;;  %v744_v3 = vld [vmem:[#allocation2 + $0x34] sm:$0xf]  ;;  %v562_v4 = vld [vmem:[#allocation2 + $0x20] sm:$0xf]  ;;  %v743_v5 = vld [vmem:[#allocation2 + $0x24] sm:$0xf0]  ;;  %v635_v6 = vor.u32 %v761_v63, %v634_v62 }
  0x15   :  { %v572_v7 = vld [vmem:[#allocation2 + $0x38] sm:$0xf0]  ;;  %v760_v8 = vld [vmem:[#allocation2 + $0xb4] sm:$0xf]  ;;  %v626_v10 = vld [vmem:[#allocation2 + $0xa0] sm:$0xf]  ;;  %v563_v12 = vor.u32 %v743_v5, %v562_v4 }
  0x16   :  { %v636_v9 = vld [vmem:[#allocation2 + $0xb8] sm:$0xf0]  ;;  %v759_v11 = vld [vmem:[#allocation2 + $0xa4] sm:$0xf0]  ;;  %v575_v13 = vor.u32 %v744_v3, %v572_v7  ;;  %v742_v15 = vld [vmem:[#allocation2 + $0x24] sm:$0xf] }
  0x17   :  { %337 = vmatpush.bf16.msrb.mxu0 %v599_v41  ;;  %350 = vmatpush.bf16.msrb.mxu1 %v663_v42  ;;  %v639_v14 = vor.u32 %v760_v8, %v636_v9  ;;  %v627_v16 = vor.u32 %v759_v11, %v626_v10  ;;  %v564_v17 = vld [vmem:[#allocation2 + $0x28] sm:$0xf0]  ;;  %v758_v18 = vld [vmem:[#allocation2 + $0xa4] sm:$0xf]  ;;  %v554_v22 = vld [vmem:[#allocation2 + $0x10] sm:$0xf] }
  0x18   :  { %313 = vmatpush.bf16.msra.mxu2 %v579_v52  ;;  %326 = vmatpush.bf16.msra.mxu3 %v643_v58  ;;  %v628_v19 = vld [vmem:[#allocation2 + $0xa8] sm:$0xf0]  ;;  %v567_v20 = vor.u32 %v742_v15, %v564_v17  ;;  %v741_v23 = vld [vmem:[#allocation2 + $0x14] sm:$0xf0]  ;;  %v618_v24 = vld [vmem:[#allocation2 + $0x90] sm:$0xf] }
  0x19   :  { %v631_v21 = vor.u32 %v758_v18, %v628_v19  ;;  %v555_v25 = vor.u32 %v741_v23, %v554_v22  ;;  %v757_v26 = vld [vmem:[#allocation2 + $0x94] sm:$0xf0]  ;;  %v740_v27 = vld [vmem:[#allocation2 + $0x14] sm:$0xf]  ;;  %v556_v28 = vld [vmem:[#allocation2 + $0x18] sm:$0xf0] }
  0x1a   :  { %v619_v29 = vor.u32 %v757_v26, %v618_v24  ;;  %v559_v30 = vor.u32 %v740_v27, %v556_v28  ;;  %v756_v31 = vld [vmem:[#allocation2 + $0x94] sm:$0xf]  ;;  %v620_v32 = vld [vmem:[#allocation2 + $0x98] sm:$0xf0]  ;;  %v546_v34 = vld [vmem:[#allocation2] sm:$0xf] }
  0x1b   :  { %338 = vmatpush.bf16.msrb.mxu0 %v591_v53  ;;  %351 = vmatpush.bf16.msrb.mxu1 %v655_v54  ;;  %v623_v33 = vor.u32 %v756_v31, %v620_v32  ;;  %v739_v35 = vld [vmem:[#allocation2 + $0x4] sm:$0xf0]  ;;  %v610_v36 = vld [vmem:[#allocation2 + $0x80] sm:$0xf]  ;;  %v738_v39 = vld [vmem:[#allocation2 + $0x4] sm:$0xf] }
  0x1c   :  { %314 = vmatpush.bf16.msra.mxu2 %v571_v0  ;;  %327 = vmatpush.bf16.msra.mxu3 %v635_v6  ;;  %v547_v37 = vor.u32 %v739_v35, %v546_v34  ;;  %v755_v38 = vld [vmem:[#allocation2 + $0x84] sm:$0xf0]  ;;  %v548_v40 = vld [vmem:[#allocation2 + $0x8] sm:$0xf0]  ;;  %v754_v43 = vld [vmem:[#allocation2 + $0x84] sm:$0xf] }
  0x1d   :  { %v611_v41 = vor.u32 %v755_v38, %v610_v36  ;;  %v551_v42 = vor.u32 %v738_v39, %v548_v40  ;;  %v612_v44 = vld [vmem:[#allocation2 + $0x88] sm:$0xf0]  ;;  %v785_v46 = vld [vmem:[%s947_s5 + $0x78] sm:$0xff]  ;;  %v784_v48 = vld [vmem:[%s947_s5 + $0x70] sm:$0xff] }
  0x1e   :  { %v615_v45 = vor.u32 %v754_v43, %v612_v44  ;;  %v777_v47 = vld [vmem:[%s947_s5 + $0x38] sm:$0xff]  ;;  %v776_v49 = vld [vmem:[%s947_s5 + $0x30] sm:$0xff]  ;;  %v783_v50 = vld [vmem:[%s947_s5 + $0x68] sm:$0xff] }
  0x1f   :  { %339 = vmatpush.bf16.msrb.mxu0 %v583_v1  ;;  %352 = vmatpush.bf16.msrb.mxu1 %v647_v2  ;;  %v775_v51 = vld [vmem:[%s947_s5 + $0x28] sm:$0xff]  ;;  %v782_v52 = vld [vmem:[%s947_s5 + $0x60] sm:$0xff]  ;;  %v781_v54 = vld [vmem:[%s947_s5 + $0x58] sm:$0xff] }
  0x20   :  { %315 = vmatpush.bf16.msra.mxu2 %v563_v12  ;;  %328 = vmatpush.bf16.msra.mxu3 %v627_v16  ;;  %v774_v53 = vld [vmem:[%s947_s5 + $0x20] sm:$0xff]  ;;  %v780_v56 = vld [vmem:[%s947_s5 + $0x50] sm:$0xff]  ;;  %v773_v5 = vld [vmem:[%s947_s5 + $0x18] sm:$0xff] }
  0x21   :  { %v47_v55 = vld [vmem:[%s944_s2] sm:$0x3]  ;;  %v779_v6 = vld [vmem:[%s947_s5 + $0x48] sm:$0xff]  ;;  %v772_v7 = vld [vmem:[%s947_s5 + $0x10] sm:$0xff] }
  0x22   :  { %v49_v57 = vperm.slane %v47_v55, 0  ;;  %v50_v58 = vperm.slane %v47_v55, 1  ;;  %v778_v8 = vld [vmem:[%s947_s5 + $0x40] sm:$0xff]  ;;  %v771_v9 = vld [vmem:[%s947_s5 + $0x8] sm:$0xff] }
  0x23   :  { %340 = vmatpush.bf16.msrb.mxu0 %v575_v13  ;;  %353 = vmatpush.bf16.msrb.mxu1 %v639_v14  ;;  %v770_v10 = vld [vmem:[%s947_s5] sm:$0xff] }
  0x24   :  { %316 = vmatpush.bf16.msra.mxu2 %v555_v25  ;;  %329 = vmatpush.bf16.msra.mxu3 %v619_v29  ;;  %v144_v11 = vld [vmem:[%s946_s4] sm:$0x3] }
  0x25   :  { %v147_v12 = vperm.slane %v144_v11, 1  ;;  %v146_v16 = vperm.slane %v144_v11, 0  ;;  %v789_v31 = vld [vmem:[%s948_s6] ss:$0 sm:$0xff] }
  0x27   :  { %341 = vmatpush.bf16.msrb.mxu0 %v567_v20  ;;  %354 = vmatpush.bf16.msrb.mxu1 %v631_v21 }
  0x28   :  { %317 = vmatpush.bf16.msra.mxu2 %v547_v37  ;;  %330 = vmatpush.bf16.msra.mxu3 %v611_v41 }
  0x2b   :  { %342 = vmatpush.bf16.msrb.mxu0 %v559_v30  ;;  %355 = vmatpush.bf16.msrb.mxu1 %v623_v33 }
  0x2c   :  { %514 = vmatpush.bf16.msrb.mxu3 %v785_v46  ;;  %501 = vmatpush.bf16.msrb.mxu2 %v777_v47 }
  0x2f   :  { %343 = vmatpush.bf16.msrb.mxu0 %v551_v42  ;;  %356 = vmatpush.bf16.msrb.mxu1 %v615_v45 }
  0x30   :  { %515 = vmatpush.bf16.msrb.mxu3 %v784_v48  ;;  %502 = vmatpush.bf16.msrb.mxu2 %v776_v49 }
  0x34   :  { %516 = vmatpush.bf16.msrb.mxu3 %v783_v50  ;;  %503 = vmatpush.bf16.msrb.mxu2 %v775_v51 }
  0x38   :  { %517 = vmatpush.bf16.msrb.mxu3 %v782_v52  ;;  %504 = vmatpush.bf16.msrb.mxu2 %v774_v53 }
  0x3c   :  { %518 = vmatpush.bf16.msrb.mxu3 %v781_v54  ;;  %505 = vmatpush.bf16.msrb.mxu2 %v773_v5 }
  0x40   :  { %519 = vmatpush.bf16.msrb.mxu3 %v780_v56  ;;  %506 = vmatpush.bf16.msrb.mxu2 %v772_v7 }
  0x44   :  { %520 = vmatpush.bf16.msrb.mxu3 %v779_v6  ;;  %507 = vmatpush.bf16.msrb.mxu2 %v771_v9 }
  0x48   :  { %521 = vmatpush.bf16.msrb.mxu3 %v778_v8  ;;  %508 = vmatpush.bf16.msrb.mxu2 %v770_v10 }
  0x8f   :  { %v88_v59 = vpop.f32.mrf.mxu0  ;;  %v101_v60 = vpop.f32.mrf.mxu1 }
  0x90   :  { %v89_v61 = vadd.f32 %v88_v59, %v49_v57  ;;  %v102_v62 = vadd.f32 %v101_v60, %v50_v58 }
  0x92   :  { %v108_v63 = vmax.f32 %v89_v61, 0.0  ;;  %v109_v0 = vmax.f32 %v102_v62, 0.0 }
  0x94   :  { %v110_v1 = vpack.c.bf16 %v108_v63, %v108_v63  ;;  %v111_v2 = vpack.c.bf16 %v109_v0, %v109_v0 }
  0x96   :  { %318 = vmatmul.bf16.vlgmr.msra.gmra.mxu2 %v110_v1  ;;  %331 = vmatmul.bf16.vlgmr.msra.gmra.mxu3 %v111_v2 }
  0x97   :  { %344 = vmatmul.bf16.vlgmr.msrb.gmra.mxu0 %v110_v1  ;;  %357 = vmatmul.bf16.vlgmr.msrb.gmra.mxu1 %v111_v2  ;;  %v90_v3 = vpop.f32.mrf.mxu0  ;;  %v103_v4 = vpop.f32.mrf.mxu1 }
 0x114   :  { %v345_v13 = vpop.f32.mrf.mxu0  ;;  %v358_v14 = vpop.f32.mrf.mxu1 }
 0x115   :  { %v346_v15 = vadd.f32 %v345_v13, %v147_v12 }
 0x117   :  { %v359_v17 = vadd.f32 %v358_v14, %v346_v15 }
 0x119   :  { %v366_v18 = vmax.f32 %v359_v17, 0.0  ;;  %v319_v19 = vpop.f32.mrf.mxu2  ;;  %v332_v20 = vpop.f32.mrf.mxu3 }
 0x11a   :  { %v320_v21 = vadd.f32 %v319_v19, %v146_v16 }
 0x11b   :  { %v368_v22 = vpack.c.bf16 %v366_v18, %v366_v18 }
 0x11c   :  { %v333_v23 = vadd.f32 %v332_v20, %v320_v21  ;;  %v347_v24 = vpop.f32.mrf.mxu0  ;;  %v360_v25 = vpop.f32.mrf.mxu1 }
 0x11d   :  { %522 = vmatmul.bf16.vlgmr.msrb.gmra.mxu3 %v368_v22 }
 0x11e   :  { %v365_v26 = vmax.f32 %v333_v23, 0.0 }
 0x120   :  { %v367_v27 = vpack.c.bf16 %v365_v26, %v365_v26 }
 0x121   :  { %v321_v28 = vpop.f32.mrf.mxu2  ;;  %v334_v29 = vpop.f32.mrf.mxu3 }
 0x122   :  { %509 = vmatmul.bf16.vlgmr.msrb.gmra.mxu2 %v367_v27 }
 0x1a0   :  { %v523_v30 = vpop.f32.mrf.mxu3 }
 0x1a5   :  { %v510_v32 = vpop.f32.mrf.mxu2 }
 0x1a6   :  { %v511_v33 = vadd.f32 %v789_v31, %v510_v32 }
 0x1a8   :  { %v524_v34 = vadd.f32 %v523_v30, %v511_v33  ;;  %v525_v35 = vpop.f32.mrf.mxu3 }
 0x1aa   :  { %528 = vst.msk [vmem:[%s949_s7] sm:$0xff] %vm527_vm2, %v524_v34 }
 0x1ad   :  { %v512_v36 = vpop.f32.mrf.mxu2 }
 0x1ae   :  { %533 = vsyncpa [#allocation3], 1 }

</bundles_post_ra>
